<compile_context>
chip_gen: v7x
topology: tpu7x:2x2x1
jax: 0.10.0
libtpu: 0.0.40
codegen_flags: <defaults>
</compile_context>

<pallas_src>
import jax
import jax.numpy as jnp
from jax.experimental import pallas as pl
from jax.experimental.pallas import tpu as pltpu


def lstm_fc_kernel(x_ref, w_ih_ref, w_hh_ref, b_ref, w_fc_ref, b_fc_ref, out_ref):
    TB, F = x_ref.shape            # x is time-major flattened: (T*B, F), bf16
    H = w_hh_ref.shape[0]
    B = out_ref.shape[0]
    T = TB // B
    H4 = 4 * H

    # Hoisted input projection: every timestep's x_t @ W_ih in ONE MXU matmul,
    # bias broadcast folded in once (not T times inside the unrolled loop).
    gates_x = (jnp.dot(x_ref[...], w_ih_ref[...],
                       preferred_element_type=jnp.float32)
               + b_ref[...])                                    # (T*B, 4H) f32

    w_hh = w_hh_ref[...]                                        # (H, 4H) bf16

    # Hoisted gate-activation constants.  One full-width tanh per step yields
    # sigmoid for the i/f/o lanes (0.5*(tanh(x/2)+1)) and tanh for the g lanes
    # simultaneously: pre/post scale = 0.5 (i,f,o) / 1.0 (g), offset = 0.5 / 0.0.
    col = jax.lax.broadcasted_iota(jnp.int32, (B, H4), 1)
    is_g = jnp.logical_and(col >= 2 * H, col < 3 * H)
    scale = jnp.where(is_g, 1.0, 0.5).astype(jnp.float32)
    offset = jnp.where(is_g, 0.0, 0.5).astype(jnp.float32)

    h = jnp.zeros((B, H), jnp.float32)
    c = jnp.zeros((B, H), jnp.float32)

    # Statically unrolled recurrence (T is small).  Per-step critical path:
    # one (B,H)x(H,4H) bf16 MXU matmul + one full-width EUP tanh + VPU ops
    # + one small tanh(c).
    # TODO(synk): for large T switch to lax.fori_loop over the VMEM-resident
    # gates_x (bounded live ranges / trace size), and optionally keep W_hh in
    # MXU weight registers via pltpu.matmul_push_rhs / matmul_acc_lhs / matmul_pop.
    # TODO(synk): for large B on v7x, add a "parallel" batch grid axis so both
    # TensorCores run independent recurrences; set vmem_limit_bytes / tile over
    # T before scaling B*T*F beyond the scoped-VMEM budget (esp. v5e: 16 MiB).
    for t in range(T):
        g_x = gates_x[t * B:(t + 1) * B, :]                     # contiguous (B,4H)
        gates = g_x + jnp.dot(h.astype(jnp.bfloat16), w_hh,
                              preferred_element_type=jnp.float32)
        acts = jnp.tanh(gates * scale) * scale + offset         # [sig|sig|tanh|sig]
        i_g = acts[:, 0 * H:1 * H]
        f_g = acts[:, 1 * H:2 * H]
        g_g = acts[:, 2 * H:3 * H]
        o_g = acts[:, 3 * H:4 * H]
        c = f_g * c + i_g * g_g
        h = o_g * jnp.tanh(c)

    # fc(out[:, -1, :]) + sigmoid.  Output tile is sublane/lane-dense (padded in
    # the wrapper), so this is a single unmasked store.
    logits = (jnp.dot(h.astype(jnp.bfloat16), w_fc_ref[...],
                      preferred_element_type=jnp.float32)
              + b_fc_ref[...])
    out_ref[...] = 0.5 * (jnp.tanh(0.5 * logits) + 1.0)         # sigmoid(logits)


def lstm_model_forward(x_btf, params):
    """x_btf: (B, T, F) float32 (PyTorch batch_first convention)."""
    w_ih, w_hh, b, w_fc, b_fc = params
    B, T, F = x_btf.shape
    H = w_hh.shape[0]
    A = w_fc.shape[1]
    assert T >= 1, "sequence length must be >= 1"

    # Sublane-dense batch (multiple of 8 for f32) and lane-dense fc output
    # (multiple of 128).  Padded rows/lanes are discarded after the call.
    B_pad = ((B + 7) // 8) * 8
    A_pad = ((A + 127) // 128) * 128

    x_p = x_btf if B_pad == B else jnp.pad(x_btf, ((0, B_pad - B), (0, 0), (0, 0)))
    # Time-major, flattened: per-step gate slice in the kernel becomes one
    # contiguous, sublane-aligned (B_pad, 4H) block of the hoisted projection.
    x_tb = jnp.transpose(x_p, (1, 0, 2)).reshape(T * B_pad, F).astype(jnp.bfloat16)

    w_fc_p = w_fc if A_pad == A else jnp.pad(w_fc, ((0, 0), (0, A_pad - A)))
    b_fc_p = b_fc if A_pad == A else jnp.pad(b_fc, ((0, 0), (0, A_pad - A)))

    # bf16 MXU operands (f32 accumulation inside the kernel).
    w_ih_b = w_ih.astype(jnp.bfloat16)
    w_hh_b = w_hh.astype(jnp.bfloat16)
    w_fc_b = w_fc_p.astype(jnp.bfloat16)

    # Advisory cost estimate so XLA schedules sensibly around this tiny kernel.
    flops = (2 * T * B_pad * F * 4 * H        # hoisted input projection
             + 2 * T * B_pad * H * 4 * H      # recurrent projections
             + 2 * B_pad * H * A_pad)         # fc
    transcendentals = T * B_pad * (4 * H + H) + B_pad * A_pad
    bytes_accessed = (2 * x_tb.size + 2 * w_ih_b.size + 2 * w_hh_b.size
                      + 4 * b.size + 2 * w_fc_b.size + 4 * b_fc_p.size
                      + 4 * B_pad * A_pad)

    vmem = pl.BlockSpec(memory_space=pltpu.MemorySpace.VMEM)

    out = pl.pallas_call(
        lstm_fc_kernel,
        out_shape=jax.ShapeDtypeStruct((B_pad, A_pad), jnp.float32),
        in_specs=[vmem] * 6,
        out_specs=vmem,
        cost_estimate=pl.CostEstimate(flops=flops,
                                      transcendentals=transcendentals,
                                      bytes_accessed=bytes_accessed),
    )(x_tb, w_ih_b, w_hh_b, b, w_fc_b, b_fc_p)

    return out[:B, :A]


def init_params(key, input_features, hidden_size, num_actions):
    """Deterministic init mirroring PyTorch shapes (stored transposed)."""
    k = 1.0 / jnp.sqrt(hidden_size)
    ks = jax.random.split(key, 6)
    w_ih = jax.random.uniform(ks[0], (input_features, 4 * hidden_size),
                              jnp.float32, -k, k)
    w_hh = jax.random.uniform(ks[1], (hidden_size, 4 * hidden_size),
                              jnp.float32, -k, k)
    b_ih = jax.random.uniform(ks[2], (1, 4 * hidden_size), jnp.float32, -k, k)
    b_hh = jax.random.uniform(ks[3], (1, 4 * hidden_size), jnp.float32, -k, k)
    kf = 1.0 / jnp.sqrt(hidden_size)
    w_fc = jax.random.uniform(ks[4], (hidden_size, num_actions),
                              jnp.float32, -kf, kf)
    b_fc = jax.random.uniform(ks[5], (1, num_actions), jnp.float32, -kf, kf)
    return (w_ih, w_hh, b_ih + b_hh, w_fc, b_fc)


def reference_forward(x_btf, params):
    """Pure-JAX reference.  Mirrors the kernel's bf16 MXU operands (with f32
    accumulation) so the parity check can stay tight; against a pure-f32
    (PyTorch-style) reference the outputs agree to ~1e-2 absolute."""
    w_ih, w_hh, b, w_fc, b_fc = params
    B, T, F = x_btf.shape
    H = w_hh.shape[0]
    w_ih_b = w_ih.astype(jnp.bfloat16)
    w_hh_b = w_hh.astype(jnp.bfloat16)
    w_fc_b = w_fc.astype(jnp.bfloat16)
    x_b = x_btf.astype(jnp.bfloat16)

    def step(carry, x_t):
        h, c = carry
        gates = (jnp.dot(x_t, w_ih_b, preferred_element_type=jnp.float32)
                 + jnp.dot(h.astype(jnp.bfloat16), w_hh_b,
                           preferred_element_type=jnp.float32)
                 + b)
        i = jax.nn.sigmoid(gates[:, 0 * H:1 * H])
        f = jax.nn.sigmoid(gates[:, 1 * H:2 * H])
        g = jnp.tanh(gates[:, 2 * H:3 * H])
        o = jax.nn.sigmoid(gates[:, 3 * H:4 * H])
        c = f * c + i * g
        h = o * jnp.tanh(c)
        return (h, c), None

    h0 = jnp.zeros((B, H), jnp.float32)
    c0 = jnp.zeros((B, H), jnp.float32)
    (h, _), _ = jax.lax.scan(step, (h0, c0), jnp.transpose(x_b, (1, 0, 2)))
    return jax.nn.sigmoid(jnp.dot(h.astype(jnp.bfloat16), w_fc_b,
                                  preferred_element_type=jnp.float32) + b_fc)


if __name__ == "__main__":
    B, T, F = 2, 8, 16          # batch, sequence length, input_features
    H, A = 32, 14               # hidden_size, num_actions

    key = jax.random.PRNGKey(0)
    k_x, k_p = jax.random.split(key)
    x = jax.random.normal(k_x, (B, T, F), jnp.float32)
    params = init_params(k_p, F, H, A)

    out = lstm_model_forward(x, params)
    out = jax.block_until_ready(out)

    ref = reference_forward(x, params)
    assert out.shape == (B, A)
    # bf16 MXU operands adopted per perf review -> compare against the
    # matched-precision reference (tolerance loosened from the pure-f32 1e-5).
    assert jnp.allclose(out, ref, atol=2e-3, rtol=2e-3)
    print("KERNEL_OK")
</pallas_src>

<mosaic_0001>
module attributes {stable_mosaic.version = 11 : i64} {
  func.func @lstm_fc_kernel(%arg0: memref<64x16xbf16, #tpu.memory_space<vmem>>, %arg1: memref<16x128xbf16, #tpu.memory_space<vmem>>, %arg2: memref<32x128xbf16, #tpu.memory_space<vmem>>, %arg3: memref<1x128xf32, #tpu.memory_space<vmem>>, %arg4: memref<32x128xbf16, #tpu.memory_space<vmem>>, %arg5: memref<1x128xf32, #tpu.memory_space<vmem>>, %arg6: memref<8x128xf32, #tpu.memory_space<vmem>>) attributes {dimension_semantics = [], scalar_prefetch = 0 : i64, scratch_operands = 0 : i64, tpu.core_type = #tpu.core_type<tc>} {
    %c0 = arith.constant 0 : index
    %c0_0 = arith.constant 0 : index
    %0 = vector.load %arg0[%c0, %c0_0] : memref<64x16xbf16, #tpu.memory_space<vmem>>, vector<64x16xbf16>
    %c0_1 = arith.constant 0 : index
    %c0_2 = arith.constant 0 : index
    %1 = vector.load %arg1[%c0_1, %c0_2] : memref<16x128xbf16, #tpu.memory_space<vmem>>, vector<16x128xbf16>
    %cst = arith.constant dense<0.000000e+00> : vector<64x128xf32>
    %2 = tpu.matmul %0, %1, %cst {dimension_numbers = #tpu.dot_dimension_numbers<[1], [0], [0], [1], [0, 0, 1, 1], [], []>} : vector<64x16xbf16>, vector<16x128xbf16>, vector<64x128xf32> -> vector<64x128xf32>
    %c0_3 = arith.constant 0 : index
    %c0_4 = arith.constant 0 : index
    %3 = vector.load %arg3[%c0_3, %c0_4] : memref<1x128xf32, #tpu.memory_space<vmem>>, vector<1x128xf32>
    %4 = vector.broadcast %3 : vector<1x128xf32> to vector<64x128xf32>
    %5 = arith.addf %2, %4 : vector<64x128xf32>
    %c0_5 = arith.constant 0 : index
    %c0_6 = arith.constant 0 : index
    %6 = vector.load %arg2[%c0_5, %c0_6] : memref<32x128xbf16, #tpu.memory_space<vmem>>, vector<32x128xbf16>
    %7 = tpu.iota {dimensions = array<i32: 1>} : vector<8x128xi32>
    %c64_i32 = arith.constant 64 : i32
    %8 = vector.broadcast %c64_i32 : i32 to vector<8x128xi32>
    %9 = arith.cmpi sge, %7, %8 : vector<8x128xi32>
    %c96_i32 = arith.constant 96 : i32
    %10 = vector.broadcast %c96_i32 : i32 to vector<8x128xi32>
    %11 = arith.cmpi slt, %7, %10 : vector<8x128xi32>
    %12 = arith.andi %9, %11 : vector<8x128xi1>
    %cst_7 = arith.constant 1.000000e+00 : f32
    %cst_8 = arith.constant 5.000000e-01 : f32
    %13 = vector.broadcast %cst_7 : f32 to vector<8x128xf32>
    %14 = vector.broadcast %cst_8 : f32 to vector<8x128xf32>
    %15 = arith.select %12, %13, %14 : vector<8x128xi1>, vector<8x128xf32>
    %cst_9 = arith.constant 0.000000e+00 : f32
    %cst_10 = arith.constant 5.000000e-01 : f32
    %16 = vector.broadcast %cst_9 : f32 to vector<8x128xf32>
    %17 = vector.broadcast %cst_10 : f32 to vector<8x128xf32>
    %18 = arith.select %12, %16, %17 : vector<8x128xi1>, vector<8x128xf32>
    %cst_11 = arith.constant 0.000000e+00 : f32
    %19 = vector.broadcast %cst_11 : f32 to vector<8x32xf32>
    %cst_12 = arith.constant 0.000000e+00 : f32
    %20 = vector.broadcast %cst_12 : f32 to vector<8x32xf32>
    %21 = vector.extract_strided_slice %5 {offsets = [0, 0], sizes = [8, 128], strides = [1, 1]} : vector<64x128xf32> to vector<8x128xf32>
    %22 = arith.truncf %19 : vector<8x32xf32> to vector<8x32xbf16>
    %cst_13 = arith.constant dense<0.000000e+00> : vector<8x128xf32>
    %23 = tpu.matmul %22, %6, %cst_13 {dimension_numbers = #tpu.dot_dimension_numbers<[1], [0], [0], [1], [0, 0, 1, 1], [], []>} : vector<8x32xbf16>, vector<32x128xbf16>, vector<8x128xf32> -> vector<8x128xf32>
    %24 = arith.addf %21, %23 : vector<8x128xf32>
    %25 = arith.mulf %24, %15 : vector<8x128xf32>
    %26 = math.tanh %25 : vector<8x128xf32>
    %27 = arith.mulf %26, %15 : vector<8x128xf32>
    %28 = arith.addf %27, %18 : vector<8x128xf32>
    %29 = vector.extract_strided_slice %28 {offsets = [0, 0], sizes = [8, 32], strides = [1, 1]} : vector<8x128xf32> to vector<8x32xf32>
    %30 = vector.extract_strided_slice %28 {offsets = [0, 32], sizes = [8, 32], strides = [1, 1]} : vector<8x128xf32> to vector<8x32xf32>
    %31 = vector.extract_strided_slice %28 {offsets = [0, 64], sizes = [8, 32], strides = [1, 1]} : vector<8x128xf32> to vector<8x32xf32>
    %32 = vector.extract_strided_slice %28 {offsets = [0, 96], sizes = [8, 32], strides = [1, 1]} : vector<8x128xf32> to vector<8x32xf32>
    %33 = arith.mulf %30, %20 : vector<8x32xf32>
    %34 = arith.mulf %29, %31 : vector<8x32xf32>
    %35 = arith.addf %33, %34 : vector<8x32xf32>
    %36 = math.tanh %35 : vector<8x32xf32>
    %37 = arith.mulf %32, %36 : vector<8x32xf32>
    %38 = vector.extract_strided_slice %5 {offsets = [8, 0], sizes = [8, 128], strides = [1, 1]} : vector<64x128xf32> to vector<8x128xf32>
    %39 = arith.truncf %37 : vector<8x32xf32> to vector<8x32xbf16>
    %cst_14 = arith.constant dense<0.000000e+00> : vector<8x128xf32>
    %40 = tpu.matmul %39, %6, %cst_14 {dimension_numbers = #tpu.dot_dimension_numbers<[1], [0], [0], [1], [0, 0, 1, 1], [], []>} : vector<8x32xbf16>, vector<32x128xbf16>, vector<8x128xf32> -> vector<8x128xf32>
    %41 = arith.addf %38, %40 : vector<8x128xf32>
    %42 = arith.mulf %41, %15 : vector<8x128xf32>
    %43 = math.tanh %42 : vector<8x128xf32>
    %44 = arith.mulf %43, %15 : vector<8x128xf32>
    %45 = arith.addf %44, %18 : vector<8x128xf32>
    %46 = vector.extract_strided_slice %45 {offsets = [0, 0], sizes = [8, 32], strides = [1, 1]} : vector<8x128xf32> to vector<8x32xf32>
    %47 = vector.extract_strided_slice %45 {offsets = [0, 32], sizes = [8, 32], strides = [1, 1]} : vector<8x128xf32> to vector<8x32xf32>
    %48 = vector.extract_strided_slice %45 {offsets = [0, 64], sizes = [8, 32], strides = [1, 1]} : vector<8x128xf32> to vector<8x32xf32>
    %49 = vector.extract_strided_slice %45 {offsets = [0, 96], sizes = [8, 32], strides = [1, 1]} : vector<8x128xf32> to vector<8x32xf32>
    %50 = arith.mulf %47, %35 : vector<8x32xf32>
    %51 = arith.mulf %46, %48 : vector<8x32xf32>
    %52 = arith.addf %50, %51 : vector<8x32xf32>
    %53 = math.tanh %52 : vector<8x32xf32>
    %54 = arith.mulf %49, %53 : vector<8x32xf32>
    %55 = vector.extract_strided_slice %5 {offsets = [16, 0], sizes = [8, 128], strides = [1, 1]} : vector<64x128xf32> to vector<8x128xf32>
    %56 = arith.truncf %54 : vector<8x32xf32> to vector<8x32xbf16>
    %cst_15 = arith.constant dense<0.000000e+00> : vector<8x128xf32>
    %57 = tpu.matmul %56, %6, %cst_15 {dimension_numbers = #tpu.dot_dimension_numbers<[1], [0], [0], [1], [0, 0, 1, 1], [], []>} : vector<8x32xbf16>, vector<32x128xbf16>, vector<8x128xf32> -> vector<8x128xf32>
    %58 = arith.addf %55, %57 : vector<8x128xf32>
    %59 = arith.mulf %58, %15 : vector<8x128xf32>
    %60 = math.tanh %59 : vector<8x128xf32>
    %61 = arith.mulf %60, %15 : vector<8x128xf32>
    %62 = arith.addf %61, %18 : vector<8x128xf32>
    %63 = vector.extract_strided_slice %62 {offsets = [0, 0], sizes = [8, 32], strides = [1, 1]} : vector<8x128xf32> to vector<8x32xf32>
    %64 = vector.extract_strided_slice %62 {offsets = [0, 32], sizes = [8, 32], strides = [1, 1]} : vector<8x128xf32> to vector<8x32xf32>
    %65 = vector.extract_strided_slice %62 {offsets = [0, 64], sizes = [8, 32], strides = [1, 1]} : vector<8x128xf32> to vector<8x32xf32>
    %66 = vector.extract_strided_slice %62 {offsets = [0, 96], sizes = [8, 32], strides = [1, 1]} : vector<8x128xf32> to vector<8x32xf32>
    %67 = arith.mulf %64, %52 : vector<8x32xf32>
    %68 = arith.mulf %63, %65 : vector<8x32xf32>
    %69 = arith.addf %67, %68 : vector<8x32xf32>
    %70 = math.tanh %69 : vector<8x32xf32>
    %71 = arith.mulf %66, %70 : vector<8x32xf32>
    %72 = vector.extract_strided_slice %5 {offsets = [24, 0], sizes = [8, 128], strides = [1, 1]} : vector<64x128xf32> to vector<8x128xf32>
    %73 = arith.truncf %71 : vector<8x32xf32> to vector<8x32xbf16>
    %cst_16 = arith.constant dense<0.000000e+00> : vector<8x128xf32>
    %74 = tpu.matmul %73, %6, %cst_16 {dimension_numbers = #tpu.dot_dimension_numbers<[1], [0], [0], [1], [0, 0, 1, 1], [], []>} : vector<8x32xbf16>, vector<32x128xbf16>, vector<8x128xf32> -> vector<8x128xf32>
    %75 = arith.addf %72, %74 : vector<8x128xf32>
    %76 = arith.mulf %75, %15 : vector<8x128xf32>
    %77 = math.tanh %76 : vector<8x128xf32>
    %78 = arith.mulf %77, %15 : vector<8x128xf32>
    %79 = arith.addf %78, %18 : vector<8x128xf32>
    %80 = vector.extract_strided_slice %79 {offsets = [0, 0], sizes = [8, 32], strides = [1, 1]} : vector<8x128xf32> to vector<8x32xf32>
    %81 = vector.extract_strided_slice %79 {offsets = [0, 32], sizes = [8, 32], strides = [1, 1]} : vector<8x128xf32> to vector<8x32xf32>
    %82 = vector.extract_strided_slice %79 {offsets = [0, 64], sizes = [8, 32], strides = [1, 1]} : vector<8x128xf32> to vector<8x32xf32>
    %83 = vector.extract_strided_slice %79 {offsets = [0, 96], sizes = [8, 32], strides = [1, 1]} : vector<8x128xf32> to vector<8x32xf32>
    %84 = arith.mulf %81, %69 : vector<8x32xf32>
    %85 = arith.mulf %80, %82 : vector<8x32xf32>
    %86 = arith.addf %84, %85 : vector<8x32xf32>
    %87 = math.tanh %86 : vector<8x32xf32>
    %88 = arith.mulf %83, %87 : vector<8x32xf32>
    %89 = vector.extract_strided_slice %5 {offsets = [32, 0], sizes = [8, 128], strides = [1, 1]} : vector<64x128xf32> to vector<8x128xf32>
    %90 = arith.truncf %88 : vector<8x32xf32> to vector<8x32xbf16>
    %cst_17 = arith.constant dense<0.000000e+00> : vector<8x128xf32>
    %91 = tpu.matmul %90, %6, %cst_17 {dimension_numbers = #tpu.dot_dimension_numbers<[1], [0], [0], [1], [0, 0, 1, 1], [], []>} : vector<8x32xbf16>, vector<32x128xbf16>, vector<8x128xf32> -> vector<8x128xf32>
    %92 = arith.addf %89, %91 : vector<8x128xf32>
    %93 = arith.mulf %92, %15 : vector<8x128xf32>
    %94 = math.tanh %93 : vector<8x128xf32>
    %95 = arith.mulf %94, %15 : vector<8x128xf32>
    %96 = arith.addf %95, %18 : vector<8x128xf32>
    %97 = vector.extract_strided_slice %96 {offsets = [0, 0], sizes = [8, 32], strides = [1, 1]} : vector<8x128xf32> to vector<8x32xf32>
    %98 = vector.extract_strided_slice %96 {offsets = [0, 32], sizes = [8, 32], strides = [1, 1]} : vector<8x128xf32> to vector<8x32xf32>
    %99 = vector.extract_strided_slice %96 {offsets = [0, 64], sizes = [8, 32], strides = [1, 1]} : vector<8x128xf32> to vector<8x32xf32>
    %100 = vector.extract_strided_slice %96 {offsets = [0, 96], sizes = [8, 32], strides = [1, 1]} : vector<8x128xf32> to vector<8x32xf32>
    %101 = arith.mulf %98, %86 : vector<8x32xf32>
    %102 = arith.mulf %97, %99 : vector<8x32xf32>
    %103 = arith.addf %101, %102 : vector<8x32xf32>
    %104 = math.tanh %103 : vector<8x32xf32>
    %105 = arith.mulf %100, %104 : vector<8x32xf32>
    %106 = vector.extract_strided_slice %5 {offsets = [40, 0], sizes = [8, 128], strides = [1, 1]} : vector<64x128xf32> to vector<8x128xf32>
    %107 = arith.truncf %105 : vector<8x32xf32> to vector<8x32xbf16>
    %cst_18 = arith.constant dense<0.000000e+00> : vector<8x128xf32>
    %108 = tpu.matmul %107, %6, %cst_18 {dimension_numbers = #tpu.dot_dimension_numbers<[1], [0], [0], [1], [0, 0, 1, 1], [], []>} : vector<8x32xbf16>, vector<32x128xbf16>, vector<8x128xf32> -> vector<8x128xf32>
    %109 = arith.addf %106, %108 : vector<8x128xf32>
    %110 = arith.mulf %109, %15 : vector<8x128xf32>
    %111 = math.tanh %110 : vector<8x128xf32>
    %112 = arith.mulf %111, %15 : vector<8x128xf32>
    %113 = arith.addf %112, %18 : vector<8x128xf32>
    %114 = vector.extract_strided_slice %113 {offsets = [0, 0], sizes = [8, 32], strides = [1, 1]} : vector<8x128xf32> to vector<8x32xf32>
    %115 = vector.extract_strided_slice %113 {offsets = [0, 32], sizes = [8, 32], strides = [1, 1]} : vector<8x128xf32> to vector<8x32xf32>
    %116 = vector.extract_strided_slice %113 {offsets = [0, 64], sizes = [8, 32], strides = [1, 1]} : vector<8x128xf32> to vector<8x32xf32>
    %117 = vector.extract_strided_slice %113 {offsets = [0, 96], sizes = [8, 32], strides = [1, 1]} : vector<8x128xf32> to vector<8x32xf32>
    %118 = arith.mulf %115, %103 : vector<8x32xf32>
    %119 = arith.mulf %114, %116 : vector<8x32xf32>
    %120 = arith.addf %118, %119 : vector<8x32xf32>
    %121 = math.tanh %120 : vector<8x32xf32>
    %122 = arith.mulf %117, %121 : vector<8x32xf32>
    %123 = vector.extract_strided_slice %5 {offsets = [48, 0], sizes = [8, 128], strides = [1, 1]} : vector<64x128xf32> to vector<8x128xf32>
    %124 = arith.truncf %122 : vector<8x32xf32> to vector<8x32xbf16>
    %cst_19 = arith.constant dense<0.000000e+00> : vector<8x128xf32>
    %125 = tpu.matmul %124, %6, %cst_19 {dimension_numbers = #tpu.dot_dimension_numbers<[1], [0], [0], [1], [0, 0, 1, 1], [], []>} : vector<8x32xbf16>, vector<32x128xbf16>, vector<8x128xf32> -> vector<8x128xf32>
    %126 = arith.addf %123, %125 : vector<8x128xf32>
    %127 = arith.mulf %126, %15 : vector<8x128xf32>
    %128 = math.tanh %127 : vector<8x128xf32>
    %129 = arith.mulf %128, %15 : vector<8x128xf32>
    %130 = arith.addf %129, %18 : vector<8x128xf32>
    %131 = vector.extract_strided_slice %130 {offsets = [0, 0], sizes = [8, 32], strides = [1, 1]} : vector<8x128xf32> to vector<8x32xf32>
    %132 = vector.extract_strided_slice %130 {offsets = [0, 32], sizes = [8, 32], strides = [1, 1]} : vector<8x128xf32> to vector<8x32xf32>
    %133 = vector.extract_strided_slice %130 {offsets = [0, 64], sizes = [8, 32], strides = [1, 1]} : vector<8x128xf32> to vector<8x32xf32>
    %134 = vector.extract_strided_slice %130 {offsets = [0, 96], sizes = [8, 32], strides = [1, 1]} : vector<8x128xf32> to vector<8x32xf32>
    %135 = arith.mulf %132, %120 : vector<8x32xf32>
    %136 = arith.mulf %131, %133 : vector<8x32xf32>
    %137 = arith.addf %135, %136 : vector<8x32xf32>
    %138 = math.tanh %137 : vector<8x32xf32>
    %139 = arith.mulf %134, %138 : vector<8x32xf32>
    %140 = vector.extract_strided_slice %5 {offsets = [56, 0], sizes = [8, 128], strides = [1, 1]} : vector<64x128xf32> to vector<8x128xf32>
    %141 = arith.truncf %139 : vector<8x32xf32> to vector<8x32xbf16>
    %cst_20 = arith.constant dense<0.000000e+00> : vector<8x128xf32>
    %142 = tpu.matmul %141, %6, %cst_20 {dimension_numbers = #tpu.dot_dimension_numbers<[1], [0], [0], [1], [0, 0, 1, 1], [], []>} : vector<8x32xbf16>, vector<32x128xbf16>, vector<8x128xf32> -> vector<8x128xf32>
    %143 = arith.addf %140, %142 : vector<8x128xf32>
    %144 = arith.mulf %143, %15 : vector<8x128xf32>
    %145 = math.tanh %144 : vector<8x128xf32>
    %146 = arith.mulf %145, %15 : vector<8x128xf32>
    %147 = arith.addf %146, %18 : vector<8x128xf32>
    %148 = vector.extract_strided_slice %147 {offsets = [0, 0], sizes = [8, 32], strides = [1, 1]} : vector<8x128xf32> to vector<8x32xf32>
    %149 = vector.extract_strided_slice %147 {offsets = [0, 32], sizes = [8, 32], strides = [1, 1]} : vector<8x128xf32> to vector<8x32xf32>
    %150 = vector.extract_strided_slice %147 {offsets = [0, 64], sizes = [8, 32], strides = [1, 1]} : vector<8x128xf32> to vector<8x32xf32>
    %151 = vector.extract_strided_slice %147 {offsets = [0, 96], sizes = [8, 32], strides = [1, 1]} : vector<8x128xf32> to vector<8x32xf32>
    %152 = arith.mulf %149, %137 : vector<8x32xf32>
    %153 = arith.mulf %148, %150 : vector<8x32xf32>
    %154 = arith.addf %152, %153 : vector<8x32xf32>
    %155 = math.tanh %154 : vector<8x32xf32>
    %156 = arith.mulf %151, %155 : vector<8x32xf32>
    %157 = arith.truncf %156 : vector<8x32xf32> to vector<8x32xbf16>
    %c0_21 = arith.constant 0 : index
    %c0_22 = arith.constant 0 : index
    %158 = vector.load %arg4[%c0_21, %c0_22] : memref<32x128xbf16, #tpu.memory_space<vmem>>, vector<32x128xbf16>
    %cst_23 = arith.constant dense<0.000000e+00> : vector<8x128xf32>
    %159 = tpu.matmul %157, %158, %cst_23 {dimension_numbers = #tpu.dot_dimension_numbers<[1], [0], [0], [1], [0, 0, 1, 1], [], []>} : vector<8x32xbf16>, vector<32x128xbf16>, vector<8x128xf32> -> vector<8x128xf32>
    %c0_24 = arith.constant 0 : index
    %c0_25 = arith.constant 0 : index
    %160 = vector.load %arg5[%c0_24, %c0_25] : memref<1x128xf32, #tpu.memory_space<vmem>>, vector<1x128xf32>
    %161 = vector.broadcast %160 : vector<1x128xf32> to vector<8x128xf32>
    %162 = arith.addf %159, %161 : vector<8x128xf32>
    %cst_26 = arith.constant 5.000000e-01 : f32
    %163 = vector.broadcast %cst_26 : f32 to vector<8x128xf32>
    %164 = arith.mulf %163, %162 : vector<8x128xf32>
    %165 = math.tanh %164 : vector<8x128xf32>
    %cst_27 = arith.constant 1.000000e+00 : f32
    %166 = vector.broadcast %cst_27 : f32 to vector<8x128xf32>
    %167 = arith.addf %165, %166 : vector<8x128xf32>
    %cst_28 = arith.constant 5.000000e-01 : f32
    %168 = vector.broadcast %cst_28 : f32 to vector<8x128xf32>
    %169 = arith.mulf %168, %167 : vector<8x128xf32>
    %c0_29 = arith.constant 0 : index
    %c0_30 = arith.constant 0 : index
    %170 = vector.load %arg6[%c0_29, %c0_30] : memref<8x128xf32, #tpu.memory_space<vmem>>, vector<8x128xf32>
    tpu.vector_store %arg6[%c0_29, %c0_30], %169 {strides = array<i32>} : memref<8x128xf32, #tpu.memory_space<vmem>>, vector<8x128xf32>,
    return
  }
}

</mosaic_0001>

<bundles_post_ra>
// kernel: tpu_custom_call.1
= control target key start
LH: loop header
LB: loop body
LE: loop exit
PB: predicated region body
PF: predicated region fallthrough
CT: control target
= control target key end

     0   :  { %v1018_v1 = vmov 0.0   ;;  %vm68_vm0 = vcmask 130048   ;;  %vm1019_vm1 = vmmov 0   ;;  %s1261_s0 = inlined_call_operand.vmem [shape: bf16[64,16], index: 0, kind: input, shape index: {}]   ;;  %s1262_s1 = inlined_call_operand.vmem [shape: bf16[16,128], index: 1, kind: input, shape index: {}]   ;;  %s1263_s2 = inlined_call_operand.vmem [shape: bf16[32,128], index: 2, kind: input, shape index: {}]   ;;  %s1264_s3 = inlined_call_operand.vmem [shape: f32[1,128], index: 3, kind: input, shape index: {}]   ;;  %s1265_s4 = inlined_call_operand.vmem [shape: bf16[32,128], index: 4, kind: input, shape index: {}]   ;;  %s1266_s5 = inlined_call_operand.vmem [shape: f32[1,128], index: 5, kind: input, shape index: {}]   ;;  %s1267_s6 = inlined_call_operand.hbm [shape: f32[8,128], index: 6, kind: output, shape index: {}]  }
   0x1   :  { %v951_v0 = vld [vmem:[%s1262_s1] sm:$0xff]   ;;  %872 = vmatprep.subr.bf16.mxu1 %v1018_v1  ;;  %v954_v4 = vld [vmem:[%s1261_s0 + $0x8] sm:$0xff]   ;;  %876 = vmatprep.mubr.msk.bf16.mxu1 %vm1019_vm1, %v1018_v1 }
   0x2   :  { %v1067_v2 = vld [vmem:[%s1263_s2] sm:$0xff]   ;;  %862 = vmatprep.subr.bf16.mxu0 %v951_v0  ;;  %v1081_v5 = vld [vmem:[%s1263_s2 + $0x8] sm:$0xff]  }
   0x3   :  { %v953_v3 = vld [vmem:[%s1261_s0] sm:$0xff]   ;;  %873 = vmatpush3.bf16.msra.mxu1 %v1067_v2  ;;  %863 = vmatpush3.bf16.msra.mxu0 %v951_v0 }
   0x4   :  { %864 = vmatprep.mubr.msk.bf16.mxu0 %vm68_vm0, %v953_v3  ;;  %874 = vmatprep.subr.bf16.mxu1 %v1018_v1 }
   0x5   :  { %888 = vmatprep.subr.bf16.mxu0 %v1018_v1 }
   0x6   :  { %865 = vmatmul.mubr.msk.bf16.vlgmr.msra.gmra.mrb[0].mxu0 %vm68_vm0, %v954_v4 }
   0x7   :  { %875 = vmatpush3.bf16.msra.mxu1 %v1081_v5  ;;  %889 = vmatpush3.bf16.msra.mxu0 %v1067_v2 }
   0x8   :  { %11 = vsyncpa [#allocation3], 0  ;;  %880 = vmatprep.subr.bf16.mxu1 %v1018_v1  ;;  %890 = vmatprep.subr.bf16.mxu0 %v1018_v1  ;;  %v1020_v6 = vmov 0   ;;  %v150_v7 = vlaneseq  ;;  %v1102_v9 = vld [vmem:[%s1264_s3] ss:$0 sm:$0xff]  ;;  %v1021_v15 = vmov 0.5  }
   0x9   :  { %s1022_s3 = smov 64   ;;  %s1023_s7 = smov 32   ;;  %vm169_vm5 = vcmask 261120   ;;  %v956_v52 = vld [vmem:[%s1261_s0 + $0x10] sm:$0xff]   ;;  %v957_v53 = vld [vmem:[%s1261_s0 + $0x18] sm:$0xff]  }
   0xa   :  { %877 = vmatmul.mubr.bf16.vlgmr.msra.gmra.mrb[0].mxu1 %v1020_v6  ;;  %v151_v8 = vand.u32 127, %v150_v7  ;;  %868 = vmatprep.mubr.msk.bf16.mxu0 %vm68_vm0, %v956_v52 }
   0xb   :  { %881 = vmatpush3.bf16.msra.mxu1 %v1067_v2  ;;  %884 = vmatprep.mubr.msk.bf16.mxu1 %vm1019_vm1, %v1018_v1 }
   0xc   :  { %882 = vmatprep.subr.bf16.mxu1 %v1018_v1  ;;  %891 = vmatpush3.bf16.msra.mxu0 %v1081_v5  ;;  %vm152_vm2 = vcmp.ge.s32.totalorder %v151_v8, 64  ;;  %vm153_vm3 = vcmp.lt.s32.totalorder %v151_v8, 96 }
   0xd   :  { %904 = vmatprep.subr.bf16.mxu0 %v1018_v1  ;;  %vm154_vm4 = vmand %vm152_vm2, %vm153_vm3 }
   0xe   :  { %v1109_v16 = vsel %vm154_vm4, 1.0, %v1021_v15  ;;  %v1112_v24 = vsel %vm154_vm4, 0.0, %v1021_v15  ;;  %869 = vmatmul.mubr.msk.bf16.gmra.mrb[4].mxu0 %vm68_vm0, %v957_v53 }
   0xf   :  { %883 = vmatpush3.bf16.msra.mxu1 %v1081_v5  ;;  %892 = vmatprep.mubr.msk.bf16.mxu0 %vm1019_vm1, %v1018_v1 }
  0x10   :  { %896 = vmatprep.subr.bf16.mxu1 %v1018_v1 }
  0xd9   :  { %v1104_v10 = vpop.f32.mrb[0].mxu0 }
  0xda   :  { %v115_v11 = vpop.f32.mrb[1].mxu0  ;;  %v124_v63 = vadd.f32 %v1104_v10, %v1102_v9 }
  0xdb   :  { %v116_v12 = vadd.f32 %v1102_v9, %v115_v11  ;;  %v1107_v13 = vpop.f32.mrb[2].mxu0 }
  0xdc   :  { %v118_v14 = vpop.f32.mrb[3].mxu0 }
  0xdd   :  { %v207_v17 = vpop.f32.mrb[0].mxu1  ;;  %v119_v37 = vadd.f32 %v1102_v9, %v118_v14 }
  0xde   :  { %v213_v18 = vadd.f32 %v207_v17, %v116_v12  ;;  %v878_v19 = vpop.f32.mrb[1].mxu1 }
  0xdf   :  { %v210_v20 = vpop.f32.mrb[2].mxu1 }
  0xe0   :  { %v214_v21 = vmul.f32 %v213_v18, %v1109_v16  ;;  %v879_v22 = vpop.f32.mrb[3].mxu1 }
  0xe1   :  { %v1145_v58 = vpop.f32.mrb[4].mxu0 }
  0xe2   :  { %960 = vtanh.f32 %v214_v21  ;;  %v1147_v59 = vpop.f32.mrb[5].mxu0 }
  0xe3   :  { %v1149_v60 = vpop.f32.mrb[6].mxu0 }
  0xe4   :  { %v1151_v61 = vpop.f32.mrb[7].mxu0 }
  0xec   :  { %v961_v23 = vpop.eup %960 }
  0xed   :  { %v216_v25 = vmul.f32 %v961_v23, %v1109_v16 }
  0xef   :  { %v217_v26 = vadd.f32 %v216_v25, %v1112_v24 }
  0xf1   :  { %220 = vrot.lane.b32.xlu0 %v217_v26, %s1022_s3  ;;  %v218_v29 = vmul.f32 0.0, %v217_v26 }
 0x163   :  { %v221_v27 = vpop.permute.xlu0 %220 }
 0x164   :  { %v223_v28 = vmul.f32 %v221_v27, %v217_v26 }
 0x166   :  { %225 = vrot.lane.b32.xlu0 %v223_v28, %s1023_s7 }
 0x1d8   :  { %v226_v30 = vpop.permute.xlu0 %225 }
 0x1d9   :  { %v228_v31 = vadd.f32 %v226_v30, %v218_v29 }
 0x1db   :  { %962 = vtanh.f32 %v228_v31 }
 0x1e5   :  { %v963_v32 = vpop.eup %962 }
 0x1e6   :  { %231 = vrot.lane.b32.xlu1 %v963_v32, %s1022_s3 }
 0x258   :  { %v232_v33 = vpop.permute.xlu1 %231 }
 0x259   :  { %v234_v34 = vmul.f32 %v232_v33, %v217_v26  ;;  %v127_v26 = vadd.f32 %v1107_v13, %v1102_v9 }
 0x25b   :  { %v235_v35 = vpack.c.bf16 %v234_v34, %v234_v34 }
 0x25d   :  { %237 = vrot.lane.b32.xlu1 %v235_v35, %s1023_s7 }
 0x2cf   :  { %v238_v36 = vpop.permute.xlu1 %237 }
 0x2d0   :  { %885 = vmatmul.mubr.msk.bf16.vlgmr.msra.gmra.mrb[4].mxu1 %vm169_vm5, %v238_v36 }
 0x2d1   :  { %897 = vmatpush3.bf16.msra.mxu1 %v1067_v2  ;;  %900 = vmatprep.mubr.msk.bf16.mxu1 %vm1019_vm1, %v1018_v1 }
 0x2d2   :  { %898 = vmatprep.subr.bf16.mxu1 %v1018_v1 }
 0x2d5   :  { %899 = vmatpush3.bf16.msra.mxu1 %v1081_v5 }
 0x2d6   :  { %912 = vmatprep.subr.bf16.mxu1 %v1018_v1 }
 0x3a3   :  { %v276_v38 = vpop.f32.mrb[4].mxu1 }
 0x3a4   :  { %v282_v39 = vadd.f32 %v276_v38, %v119_v37  ;;  %v886_v40 = vpop.f32.mrb[5].mxu1 }
 0x3a5   :  { %v279_v41 = vpop.f32.mrb[6].mxu1 }
 0x3a6   :  { %v283_v42 = vmul.f32 %v282_v39, %v1109_v16  ;;  %v887_v43 = vpop.f32.mrb[7].mxu1 }
 0x3a8   :  { %964 = vtanh.f32 %v283_v42 }
 0x3b2   :  { %v965_v44 = vpop.eup %964 }
 0x3b3   :  { %v285_v45 = vmul.f32 %v965_v44, %v1109_v16 }
 0x3b5   :  { %v286_v46 = vadd.f32 %v285_v45, %v1112_v24  ;;  %v132_v45 = vadd.f32 %v1102_v9, %v1147_v59 }
 0x3b7   :  { %289 = vrot.lane.b32.xlu0 %v286_v46, %s1022_s3  ;;  %v287_v49 = vmul.f32 %v286_v46, %v228_v31 }
 0x429   :  { %v290_v47 = vpop.permute.xlu0 %289 }
 0x42a   :  { %v292_v48 = vmul.f32 %v290_v47, %v286_v46 }
 0x42c   :  { %294 = vrot.lane.b32.xlu1 %v292_v48, %s1023_s7 }
 0x49e   :  { %v295_v50 = vpop.permute.xlu1 %294 }
 0x49f   :  { %v297_v51 = vadd.f32 %v295_v50, %v287_v49 }
 0x4a1   :  { %966 = vtanh.f32 %v297_v51 }
 0x4ab   :  { %v967_v54 = vpop.eup %966 }
 0x4ac   :  { %300 = vrot.lane.b32.xlu0 %v967_v54, %s1022_s3 }
 0x51e   :  { %v301_v55 = vpop.permute.xlu0 %300 }
 0x51f   :  { %v303_v56 = vmul.f32 %v301_v55, %v286_v46 }
 0x521   :  { %v304_v57 = vpack.c.bf16 %v303_v56, %v303_v56 }
 0x523   :  { %306 = vrot.lane.b32.xlu1 %v304_v57, %s1023_s7 }
 0x595   :  { %v307_v62 = vpop.permute.xlu1 %306 }
 0x596   :  { %893 = vmatmul.mubr.msk.bf16.vlgmr.msra.gmra.mrb[8].mxu0 %vm169_vm5, %v307_v62 }
 0x597   :  { %905 = vmatpush3.bf16.msra.mxu0 %v1067_v2  ;;  %908 = vmatprep.mubr.msk.bf16.mxu0 %vm1019_vm1, %v1018_v1 }
 0x598   :  { %906 = vmatprep.subr.bf16.mxu0 %v1018_v1 }
 0x59b   :  { %907 = vmatpush3.bf16.msra.mxu0 %v1081_v5 }
 0x59c   :  { %920 = vmatprep.subr.bf16.mxu0 %v1018_v1 }
 0x669   :  { %v345_v0 = vpop.f32.mrb[8].mxu0 }
 0x66a   :  { %v351_v3 = vadd.f32 %v345_v0, %v124_v63  ;;  %v894_v4 = vpop.f32.mrb[9].mxu0 }
 0x66b   :  { %v348_v6 = vpop.f32.mrb[10].mxu0 }
 0x66c   :  { %v352_v7 = vmul.f32 %v351_v3, %v1109_v16  ;;  %v895_v8 = vpop.f32.mrb[11].mxu0 }
 0x66e   :  { %968 = vtanh.f32 %v352_v7  ;;  %v135_v7 = vadd.f32 %v1102_v9, %v1151_v61 }
 0x678   :  { %v969_v11 = vpop.eup %968 }
 0x679   :  { %v354_v12 = vmul.f32 %v969_v11, %v1109_v16 }
 0x67b   :  { %v355_v14 = vadd.f32 %v354_v12, %v1112_v24 }
 0x67d   :  { %358 = vrot.lane.b32.xlu0 %v355_v14, %s1022_s3  ;;  %v356_v10 = vmul.f32 %v355_v14, %v297_v51 }
 0x6ef   :  { %v359_v15 = vpop.permute.xlu0 %358 }
 0x6f0   :  { %v361_v17 = vmul.f32 %v359_v15, %v355_v14 }
 0x6f2   :  { %363 = vrot.lane.b32.xlu1 %v361_v17, %s1023_s7 }
 0x764   :  { %v364_v18 = vpop.permute.xlu1 %363 }
 0x765   :  { %v366_v19 = vadd.f32 %v364_v18, %v356_v10 }
 0x767   :  { %970 = vtanh.f32 %v366_v19 }
 0x771   :  { %v971_v20 = vpop.eup %970 }
 0x772   :  { %369 = vrot.lane.b32.xlu0 %v971_v20, %s1022_s3 }
 0x7e4   :  { %v370_v21 = vpop.permute.xlu0 %369 }
 0x7e5   :  { %v372_v22 = vmul.f32 %v370_v21, %v355_v14 }
 0x7e7   :  { %v373_v23 = vpack.c.bf16 %v372_v22, %v372_v22 }
 0x7e9   :  { %375 = vrot.lane.b32.xlu1 %v373_v23, %s1023_s7 }
 0x85b   :  { %v376_v25 = vpop.permute.xlu1 %375 }
 0x85c   :  { %901 = vmatmul.mubr.msk.bf16.vlgmr.msra.gmra.mrb[8].mxu1 %vm169_vm5, %v376_v25 }
 0x85d   :  { %913 = vmatpush3.bf16.msra.mxu1 %v1067_v2  ;;  %916 = vmatprep.mubr.msk.bf16.mxu1 %vm1019_vm1, %v1018_v1 }
 0x85e   :  { %914 = vmatprep.subr.bf16.mxu1 %v1018_v1 }
 0x861   :  { %915 = vmatpush3.bf16.msra.mxu1 %v1081_v5 }
 0x862   :  { %928 = vmatprep.subr.bf16.mxu1 %v1018_v1 }
 0x92f   :  { %v414_v27 = vpop.f32.mrb[8].mxu1 }
 0x930   :  { %v420_v28 = vadd.f32 %v414_v27, %v127_v26  ;;  %v902_v29 = vpop.f32.mrb[9].mxu1 }
 0x931   :  { %v417_v30 = vpop.f32.mrb[10].mxu1 }
 0x932   :  { %v421_v31 = vmul.f32 %v420_v28, %v1109_v16  ;;  %v903_v32 = vpop.f32.mrb[11].mxu1  ;;  %v140_v28 = vadd.f32 %v1145_v58, %v1102_v9 }
 0x934   :  { %972 = vtanh.f32 %v421_v31 }
 0x93e   :  { %v973_v33 = vpop.eup %972 }
 0x93f   :  { %v423_v34 = vmul.f32 %v973_v33, %v1109_v16 }
 0x941   :  { %v424_v35 = vadd.f32 %v423_v34, %v1112_v24 }
 0x943   :  { %427 = vrot.lane.b32.xlu0 %v424_v35, %s1022_s3  ;;  %v425_v13 = vmul.f32 %v424_v35, %v366_v19 }
 0x9b5   :  { %v428_v36 = vpop.permute.xlu0 %427 }
 0x9b6   :  { %v430_v37 = vmul.f32 %v428_v36, %v424_v35 }
 0x9b8   :  { %432 = vrot.lane.b32.xlu1 %v430_v37, %s1023_s7 }
 0xa2a   :  { %v433_v38 = vpop.permute.xlu1 %432 }
 0xa2b   :  { %v435_v39 = vadd.f32 %v433_v38, %v425_v13 }
 0xa2d   :  { %974 = vtanh.f32 %v435_v39 }
 0xa37   :  { %v975_v40 = vpop.eup %974 }
 0xa38   :  { %438 = vrot.lane.b32.xlu0 %v975_v40, %s1022_s3 }
 0xaaa   :  { %v439_v41 = vpop.permute.xlu0 %438 }
 0xaab   :  { %v441_v42 = vmul.f32 %v439_v41, %v424_v35 }
 0xaad   :  { %v442_v43 = vpack.c.bf16 %v441_v42, %v441_v42 }
 0xaaf   :  { %444 = vrot.lane.b32.xlu1 %v442_v43, %s1023_s7 }
 0xb21   :  { %v445_v44 = vpop.permute.xlu1 %444 }
 0xb22   :  { %909 = vmatmul.mubr.msk.bf16.vlgmr.msra.gmra.mrb[12].mxu0 %vm169_vm5, %v445_v44 }
 0xb23   :  { %921 = vmatpush3.bf16.msra.mxu0 %v1067_v2  ;;  %924 = vmatprep.mubr.msk.bf16.mxu0 %vm1019_vm1, %v1018_v1 }
 0xb24   :  { %922 = vmatprep.subr.bf16.mxu0 %v1018_v1 }
 0xb27   :  { %923 = vmatpush3.bf16.msra.mxu0 %v1081_v5 }
 0xb28   :  { %936 = vmatprep.subr.bf16.mxu0 %v1018_v1 }
 0xbf5   :  { %v483_v46 = vpop.f32.mrb[12].mxu0 }
 0xbf6   :  { %v489_v47 = vadd.f32 %v483_v46, %v132_v45  ;;  %v910_v48 = vpop.f32.mrb[13].mxu0  ;;  %v143_v46 = vadd.f32 %v1149_v60, %v1102_v9 }
 0xbf7   :  { %v486_v49 = vpop.f32.mrb[14].mxu0 }
 0xbf8   :  { %v490_v50 = vmul.f32 %v489_v47, %v1109_v16  ;;  %v911_v51 = vpop.f32.mrb[15].mxu0 }
 0xbfa   :  { %976 = vtanh.f32 %v490_v50 }
 0xc04   :  { %v977_v52 = vpop.eup %976 }
 0xc05   :  { %v492_v53 = vmul.f32 %v977_v52, %v1109_v16 }
 0xc07   :  { %v493_v54 = vadd.f32 %v492_v53, %v1112_v24 }
 0xc09   :  { %496 = vrot.lane.b32.xlu0 %v493_v54, %s1022_s3  ;;  %v494_v57 = vmul.f32 %v493_v54, %v435_v39 }
 0xc7b   :  { %v497_v55 = vpop.permute.xlu0 %496 }
 0xc7c   :  { %v499_v56 = vmul.f32 %v497_v55, %v493_v54 }
 0xc7e   :  { %501 = vrot.lane.b32.xlu1 %v499_v56, %s1023_s7 }
 0xcf0   :  { %v502_v59 = vpop.permute.xlu1 %501 }
 0xcf1   :  { %v504_v62 = vadd.f32 %v502_v59, %v494_v57 }
 0xcf3   :  { %978 = vtanh.f32 %v504_v62 }
 0xcfd   :  { %v979_v63 = vpop.eup %978 }
 0xcfe   :  { %507 = vrot.lane.b32.xlu0 %v979_v63, %s1022_s3 }
 0xd70   :  { %v508_v0 = vpop.permute.xlu0 %507 }
 0xd71   :  { %v510_v3 = vmul.f32 %v508_v0, %v493_v54 }
 0xd73   :  { %v511_v4 = vpack.c.bf16 %v510_v3, %v510_v3 }
 0xd75   :  { %513 = vrot.lane.b32.xlu1 %v511_v4, %s1023_s7 }
 0xde7   :  { %v514_v6 = vpop.permute.xlu1 %513 }
 0xde8   :  { %917 = vmatmul.mubr.msk.bf16.vlgmr.msra.gmra.mrb[12].mxu1 %vm169_vm5, %v514_v6  ;;  %v826_v6 = vld [vmem:[%s1266_s5] ss:$0 sm:$0xff] }
 0xde9   :  { %929 = vmatpush3.bf16.msra.mxu1 %v1067_v2  ;;  %932 = vmatprep.mubr.msk.bf16.mxu1 %vm1019_vm1, %v1018_v1 }
 0xdea   :  { %930 = vmatprep.subr.bf16.mxu1 %v1018_v1 }
 0xded   :  { %931 = vmatpush3.bf16.msra.mxu1 %v1081_v5 }
 0xebb   :  { %v552_v8 = vpop.f32.mrb[12].mxu1 }
 0xebc   :  { %v558_v11 = vadd.f32 %v552_v8, %v135_v7  ;;  %v918_v12 = vpop.f32.mrb[13].mxu1 }
 0xebd   :  { %v555_v14 = vpop.f32.mrb[14].mxu1 }
 0xebe   :  { %v559_v15 = vmul.f32 %v558_v11, %v1109_v16  ;;  %v919_v17 = vpop.f32.mrb[15].mxu1 }
 0xec0   :  { %980 = vtanh.f32 %v559_v15 }
 0xeca   :  { %v981_v10 = vpop.eup %980 }
 0xecb   :  { %v561_v2 = vmul.f32 %v981_v10, %v1109_v16 }
 0xecd   :  { %v562_v18 = vadd.f32 %v561_v2, %v1112_v24 }
 0xecf   :  { %565 = vrot.lane.b32.xlu0 %v562_v18, %s1022_s3  ;;  %v563_v61 = vmul.f32 %v562_v18, %v504_v62  ;;  %v958_v62 = vld [vmem:[%s1265_s4] sm:$0xff]  }
 0xf41   :  { %v566_v19 = vpop.permute.xlu0 %565 }
 0xf42   :  { %v568_v5 = vmul.f32 %v566_v19, %v562_v18 }
 0xf44   :  { %570 = vrot.lane.b32.xlu1 %v568_v5, %s1023_s7 }
 0xfb6   :  { %v571_v20 = vpop.permute.xlu1 %570 }
 0xfb7   :  { %v573_v21 = vadd.f32 %v571_v20, %v563_v61 }
 0xfb9   :  { %982 = vtanh.f32 %v573_v21 }
 0xfc3   :  { %v983_v22 = vpop.eup %982 }
 0xfc4   :  { %576 = vrot.lane.b32.xlu0 %v983_v22, %s1022_s3 }
0x1036   :  { %v577_v23 = vpop.permute.xlu0 %576 }
0x1037   :  { %v579_v25 = vmul.f32 %v577_v23, %v562_v18 }
0x1039   :  { %v580_v26 = vpack.c.bf16 %v579_v25, %v579_v25 }
0x103b   :  { %582 = vrot.lane.b32.xlu1 %v580_v26, %s1023_s7 }
0x10ad   :  { %v583_v27 = vpop.permute.xlu1 %582 }
0x10ae   :  { %925 = vmatmul.mubr.msk.bf16.vlgmr.msra.gmra.mrb[16].mxu0 %vm169_vm5, %v583_v27 }
0x10af   :  { %940 = vmatprep.mubr.msk.bf16.mxu0 %vm1019_vm1, %v1018_v1  ;;  %937 = vmatpush3.bf16.msra.mxu0 %v958_v62 }
0x10b0   :  { %938 = vmatprep.subr.bf16.mxu0 %v1018_v1 }
0x1181   :  { %v621_v29 = vpop.f32.mrb[16].mxu0 }
0x1182   :  { %v627_v30 = vadd.f32 %v621_v29, %v140_v28  ;;  %v926_v31 = vpop.f32.mrb[17].mxu0 }
0x1183   :  { %v624_v32 = vpop.f32.mrb[18].mxu0 }
0x1184   :  { %v628_v33 = vmul.f32 %v627_v30, %v1109_v16  ;;  %v927_v34 = vpop.f32.mrb[19].mxu0 }
0x1186   :  { %984 = vtanh.f32 %v628_v33 }
0x1190   :  { %v985_v35 = vpop.eup %984 }
0x1191   :  { %v630_v36 = vmul.f32 %v985_v35, %v1109_v16 }
0x1193   :  { %v631_v37 = vadd.f32 %v630_v36, %v1112_v24 }
0x1195   :  { %634 = vrot.lane.b32.xlu0 %v631_v37, %s1022_s3  ;;  %v632_v58 = vmul.f32 %v631_v37, %v573_v21 }
0x1207   :  { %v635_v13 = vpop.permute.xlu0 %634 }
0x1208   :  { %v637_v38 = vmul.f32 %v635_v13, %v631_v37 }
0x120a   :  { %639 = vrot.lane.b32.xlu1 %v637_v38, %s1023_s7 }
0x127c   :  { %v640_v39 = vpop.permute.xlu1 %639 }
0x127d   :  { %v642_v40 = vadd.f32 %v640_v39, %v632_v58 }
0x127f   :  { %986 = vtanh.f32 %v642_v40 }
0x1289   :  { %v987_v41 = vpop.eup %986 }
0x128a   :  { %645 = vrot.lane.b32.xlu0 %v987_v41, %s1022_s3 }
0x12fc   :  { %v646_v42 = vpop.permute.xlu0 %645 }
0x12fd   :  { %v648_v43 = vmul.f32 %v646_v42, %v631_v37 }
0x12ff   :  { %v649_v44 = vpack.c.bf16 %v648_v43, %v648_v43 }
0x1301   :  { %651 = vrot.lane.b32.xlu1 %v649_v44, %s1023_s7 }
0x1373   :  { %v652_v45 = vpop.permute.xlu1 %651 }
0x1374   :  { %933 = vmatmul.mubr.msk.bf16.vlgmr.msra.gmra.mrb[16].mxu1 %vm169_vm5, %v652_v45 }
0x1447   :  { %v690_v47 = vpop.f32.mrb[16].mxu1 }
0x1448   :  { %v696_v48 = vadd.f32 %v690_v47, %v143_v46  ;;  %v934_v49 = vpop.f32.mrb[17].mxu1 }
0x1449   :  { %v693_v50 = vpop.f32.mrb[18].mxu1 }
0x144a   :  { %v697_v51 = vmul.f32 %v696_v48, %v1109_v16  ;;  %v935_v52 = vpop.f32.mrb[19].mxu1 }
0x144c   :  { %988 = vtanh.f32 %v697_v51 }
0x1456   :  { %v989_v53 = vpop.eup %988 }
0x1457   :  { %v699_v54 = vmul.f32 %v989_v53, %v1109_v16  ;;  %v959_v16 = vld [vmem:[%s1265_s4 + $0x8] sm:$0xff]   ;;  %s1024_s4 = smov [#allocation2]  }
0x1458   :  { %939 = vmatpush3.bf16.msra.mxu0 %v959_v16  ;;  %s799_s17 = sshll.u32 %s1024_s4, 4  ;;  %s800_s17 = int_to_ptr.vmem [resolvable:$true] %s799_s17 }
0x1459   :  { %v700_v55 = vadd.f32 %v699_v54, %v1112_v24  ;;  %s994_s18 = scalar_lea.vmem %s800_s17, 128  ;;  %p999_p1 = scmp.lt.s32.totalorder %s800_s17, %s800_s17 }
0x145a   :  { %p995_p0 = scmp.ne.s32.totalorder %s800_s17, %s994_s18  ;;  %p1000_p2 = scmp.lt.s32.totalorder %s994_s18, %s994_s18 }
0x145b   :  { %703 = vrot.lane.b32.xlu0 %v700_v55, %s1022_s3  ;;  %v701_v9 = vmul.f32 %v700_v55, %v642_v40 }
0x145c   :  { %p1001_p3 = por %p1000_p2, %p999_p1 }
0x145e   :  { %p1002_p4 = pnand %p1001_p3, %p995_p0 }
0x14cd   :  { %v704_v56 = vpop.permute.xlu0 %703 }
0x14ce   :  { %v706_v57 = vmul.f32 %v704_v56, %v700_v55 }
0x14d0   :  { %708 = vrot.lane.b32.xlu1 %v706_v57, %s1023_s7 }
0x1542   :  { %v709_v60 = vpop.permute.xlu1 %708 }
0x1543   :  { %v711_v59 = vadd.f32 %v709_v60, %v701_v9 }
0x1545   :  { %990 = vtanh.f32 %v711_v59 }
0x154f   :  { %v991_v24 = vpop.eup %990 }
0x1550   :  { %714 = vrot.lane.b32.xlu0 %v991_v24, %s1022_s3 }
0x15c2   :  { %v715_v63 = vpop.permute.xlu0 %714 }
0x15c3   :  { %v717_v0 = vmul.f32 %v715_v63, %v700_v55 }
0x15c5   :  { %v718_v3 = vpack.c.bf16 %v717_v0, %v717_v0 }
0x15c7   :  { %731 = vrot.lane.b32.xlu1 %v718_v3, %s1023_s7 }
0x1639   :  { %v732_v4 = vpop.permute.xlu1 %731 }
0x163a   :  { %941 = vmatmul.mubr.msk.bf16.vlgmr.msra.gmra.mrb[20].mxu0 %vm169_vm5, %v732_v4 }
0x170d   :  { %v782_v7 = vpop.f32.mrb[20].mxu0 }
0x170e   :  { %v783_v8 = vadd.f32 %v826_v6, %v782_v7  ;;  %v942_v11 = vpop.f32.mrb[21].mxu0 }
0x170f   :  { %v785_v1 = vpop.f32.mrb[22].mxu0 }
0x1710   :  { %v788_v12 = vmul.f32 0.5, %v783_v8  ;;  %v943_v14 = vpop.f32.mrb[23].mxu0 }
0x1712   :  { %992 = vtanh.f32 %v788_v12 }
0x171c   :  { %v993_v15 = vpop.eup %992 }
0x171d   :  { %v790_v17 = vadd.f32 1.0, %v993_v15 }
0x171f   :  { %v791_v10 = vmul.f32 0.5, %v790_v17 }
0x1721   :  { %792 = vst [vmem:[#allocation2] sm:$0xff] %v791_v10 }
0x1722   :  { %1005 = shalt.err (!%p1002_p4)
}
0x1723   :  { %s1006_s20 = scalar_lea.hbm %s1267_s6, 128 }
0x1724   :  { %p1007_p5 = scmp.ne.s32.totalorder %s1267_s6, %s1006_s20  ;;  %p1010_p6 = scmp.lt.u32.totalorder %s1006_s20, %s1267_s6 }
0x1726   :  { %p1012_p7 = pnand %p1010_p6, %p1007_p5 }
0x1728   :  { %1015 = shalt.err (!%p1012_p7)
}
0x1729   :  { %802 = dma.vmem_to_hbm [thread:$0]  %s800_s17, 128, %s1267_s6, [#allocation3]  }
0x172a   :  { %1016 = dma.done.wait [#allocation3], 128  }
0x172b   :  { %1017 = vsyncadd [#allocation3], 4294967168 }
0x172c   :  { %806 = vsyncpa [#allocation3], 1 }

</bundles_post_ra>
